<compile_context>
chip_gen: v7x
topology: tpu7x:2x2x1
jax: 0.10.0
libtpu: 0.0.40
codegen_flags: <defaults>
</compile_context>

<pallas_src>
import functools
import math

import jax
import jax.numpy as jnp
from jax.experimental import pallas as pl
from jax.experimental.pallas import tpu as pltpu


def _round_up(x, m):
    return ((x + m - 1) // m) * m


def _cdiv(a, b):
    return -(-a // b)


def _gnn_kernel(adj_ref, feat_ref, w_ref, out_ref, *, active):
    """out_tile (+)= adj_tile @ (feat_block @ weight); tanh at the last k step."""
    k = pl.program_id(1)

    @pl.when(k == 0)
    def _():
        out_ref[...] = jnp.zeros_like(out_ref)

    # Support tile (tk, f_out_pad): small matmul, f32 accumulate on the MXU.
    support = jnp.dot(feat_ref[...], w_ref[...], preferred_element_type=jnp.float32)

    # Aggregation matmul runs natively in adj's streaming dtype (full bf16 MXU
    # rate when adj is bf16 — no per-tile upcast); accumulation stays f32.
    out_ref[...] += jnp.dot(
        adj_ref[...],
        support.astype(adj_ref.dtype),
        preferred_element_type=jnp.float32,
    )

    if active:
        @pl.when(k == pl.num_programs(1) - 1)
        def _():
            out_ref[...] = jnp.tanh(out_ref[...])  # EUP


def gnn_layer(features, weight, adj, active=True, *, adj_stream_dtype=None,
              tile_m=512, tile_k=512):
    """output = [tanh](adj @ (features @ weight)), matching GNNLayer.forward.

    adj_stream_dtype: optional narrow dtype (e.g. jnp.bfloat16) for the O(N^2)
    adj stream.  Exact only for values representable in that dtype (0/1
    adjacencies); the support tile is also cast to it so the big matmul takes
    the native bf16 MXU path (results then differ at ~1e-2 relative).
    Leave None (f32) for weighted adjacencies.
    """
    n, f_in = features.shape
    f_out = weight.shape[1]
    assert weight.shape[0] == f_in and adj.shape == (n, n)

    lane = 128
    f_out_pad = _round_up(f_out, lane)

    # Row tiling: >=2 row blocks whenever possible so the "parallel" axis
    # shards across both v7x TensorCores; tm sized close to n/blocks to keep
    # adj row padding minimal.
    n8 = _round_up(n, 8)
    m_blocks = max(2 if n8 >= 16 else 1, _cdiv(n8, tile_m))
    tm = _round_up(_cdiv(n8, m_blocks), 8)
    n_pad_m = m_blocks * tm

    # K (reduction) tiling, last grid axis: lane-multiple tiles sized close to
    # n to keep adj column padding minimal.
    k_blocks = max(1, _cdiv(n, tile_k))
    tk = _round_up(_cdiv(n, k_blocks), lane)
    n_pad_k = k_blocks * tk

    features = jnp.asarray(features, jnp.float32)
    weight = jnp.asarray(weight, jnp.float32)
    adj = jnp.asarray(adj, jnp.float32)

    feat_p = jnp.pad(features, ((0, n_pad_k - n), (0, 0)))
    w_p = jnp.pad(weight, ((0, 0), (0, f_out_pad - f_out)))
    adj_p = jnp.pad(adj, ((0, n_pad_m - n), (0, n_pad_k - n)))
    if adj_stream_dtype is not None:
        adj_p = adj_p.astype(adj_stream_dtype)
    adj_itemsize = int(jnp.dtype(adj_p.dtype).itemsize)

    flops = (2 * n_pad_m * n_pad_k * f_out_pad            # aggregation
             + 2 * m_blocks * n_pad_k * f_in * f_out_pad)  # fused support recompute
    bytes_accessed = (
        adj_itemsize * n_pad_m * n_pad_k       # adj streamed once
        + 4 * m_blocks * n_pad_k * f_in        # features re-streamed per row block
        + 4 * f_in * f_out_pad                 # resident weight (one fetch)
        + 4 * n_pad_m * f_out_pad              # output write
    )

    out_p = pl.pallas_call(
        functools.partial(_gnn_kernel, active=active),
        out_shape=jax.ShapeDtypeStruct((n_pad_m, f_out_pad), jnp.float32),
        grid=(m_blocks, k_blocks),
        in_specs=[
            pl.BlockSpec((tm, tk), lambda i, k: (i, k)),           # adj stream
            pl.BlockSpec((tk, f_in), lambda i, k: (k, 0)),         # features block
            pl.BlockSpec((f_in, f_out_pad), lambda i, k: (0, 0)),  # resident weight
        ],
        out_specs=pl.BlockSpec((tm, f_out_pad), lambda i, k: (i, 0)),
        compiler_params=pltpu.CompilerParams(
            dimension_semantics=("parallel", "arbitrary"),
            vmem_limit_bytes=32 * 1024 * 1024,
        ),
        cost_estimate=pl.CostEstimate(
            flops=flops,
            transcendentals=(n_pad_m * f_out_pad) if active else 0,
            bytes_accessed=bytes_accessed,
        ),
    )(adj_p, feat_p, w_p)

    return out_p[:n, :f_out]


def xavier_uniform(key, fan_in, fan_out, dtype=jnp.float32):
    # Matches torch.nn.init.xavier_uniform_: bound = sqrt(6 / (fan_in + fan_out))
    bound = math.sqrt(6.0 / (fan_in + fan_out))
    return jax.random.uniform(
        key, (fan_in, fan_out), dtype=dtype, minval=-bound, maxval=bound
    )


def _reference(features, weight, adj, active):
    hi = jax.lax.Precision.HIGHEST
    support = jnp.dot(features, weight, precision=hi)
    out = jnp.dot(adj, support, precision=hi)
    return jnp.tanh(out) if active else out


if __name__ == "__main__":
    key = jax.random.PRNGKey(0)
    k_feat, k_adj, k_w, k2_feat, k2_adj, k2_w = jax.random.split(key, 6)

    # --- Case 1: small shapes, thresholded 0/1 adjacency ---------------------
    n, f_in, f_out = 16, 32, 8
    features = jax.random.normal(k_feat, (n, f_in), dtype=jnp.float32)
    adj = (jax.random.uniform(k_adj, (n, n), dtype=jnp.float32) > 0.7).astype(
        jnp.float32
    )
    weight = xavier_uniform(k_w, f_in, f_out)

    ref = _reference(features, weight, adj, active=True)

    # Exact path (f32 stream).
    out_exact = jax.block_until_ready(gnn_layer(features, weight, adj, active=True))
    assert out_exact.shape == (n, f_out)
    assert jnp.allclose(out_exact, ref, atol=1e-5, rtol=1e-5), float(
        jnp.max(jnp.abs(out_exact - ref))
    )

    # Fast path: bf16 adj stream (exact for 0/1 adj) + bf16 support cast for
    # the native bf16 MXU path -> compare at bf16-level tolerance.
    out_bf16 = jax.block_until_ready(
        gnn_layer(features, weight, adj, active=True, adj_stream_dtype=jnp.bfloat16)
    )
    assert jnp.allclose(out_bf16, ref, atol=3e-2, rtol=3e-2), float(
        jnp.max(jnp.abs(out_bf16 - ref))
    )

    # No activation.
    out_noact = jax.block_until_ready(gnn_layer(features, weight, adj, active=False))
    ref_noact = _reference(features, weight, adj, active=False)
    assert jnp.allclose(out_noact, ref_noact, atol=1e-5, rtol=1e-5)

    # --- Case 2: ragged shapes, weighted adjacency (f32 stream), multi-tile --
    n2, f_in2, f_out2 = 300, 48, 20
    features2 = jax.random.normal(k2_feat, (n2, f_in2), dtype=jnp.float32)
    adj2 = jax.random.uniform(k2_adj, (n2, n2), dtype=jnp.float32)
    weight2 = xavier_uniform(k2_w, f_in2, f_out2)

    out2 = jax.block_until_ready(
        gnn_layer(features2, weight2, adj2, active=True, tile_m=128, tile_k=128)
    )
    ref2 = _reference(features2, weight2, adj2, active=True)
    assert out2.shape == (n2, f_out2)
    assert jnp.allclose(out2, ref2, atol=2e-4, rtol=1e-4), float(
        jnp.max(jnp.abs(out2 - ref2))
    )

    print("KERNEL_OK")
</pallas_src>

<mosaic_0001>
module attributes {stable_mosaic.version = 11 : i64} {
  func.func @_gnn_kernel(%arg0: i32, %arg1: i32, %arg2: memref<8x128xf32, #tpu.memory_space<vmem>>, %arg3: memref<128x32xf32, #tpu.memory_space<vmem>>, %arg4: memref<32x128xf32, #tpu.memory_space<vmem>>, %arg5: memref<8x128xf32, #tpu.memory_space<vmem>>) attributes {dimension_semantics = [#tpu.dimension_semantics<parallel>, #tpu.dimension_semantics<arbitrary>], iteration_bounds = array<i64: 2, 1>, scalar_prefetch = 0 : i64, scratch_operands = 0 : i64, tpu.core_type = #tpu.core_type<tc>, window_params = [{transform_indices = @transform_0, window_bounds = array<i64: 8, 128>}, {transform_indices = @transform_1, window_bounds = array<i64: 128, 32>}, {pipeline_mode = #tpu.pipeline_mode<synchronous>, transform_indices = @transform_2, window_bounds = array<i64: 32, 128>}, {transform_indices = @transform_3, window_bounds = array<i64: 8, 128>}]} {
    %c0_i32 = arith.constant 0 : i32
    %0 = arith.cmpi eq, %arg1, %c0_i32 : i32
    %1 = arith.extui %0 : i1 to i32
    %c0_i32_0 = arith.constant 0 : i32
    %2 = arith.cmpi ne, %1, %c0_i32_0 : i32
    scf.if %2 {
      %cst_13 = arith.constant 0.000000e+00 : f32
      %14 = vector.broadcast %cst_13 : f32 to vector<8x128xf32>
      %c0_14 = arith.constant 0 : index
      %c0_15 = arith.constant 0 : index
      %15 = vector.load %arg5[%c0_14, %c0_15] : memref<8x128xf32, #tpu.memory_space<vmem>>, vector<8x128xf32>
      tpu.vector_store %arg5[%c0_14, %c0_15], %14 {strides = array<i32>} : memref<8x128xf32, #tpu.memory_space<vmem>>, vector<8x128xf32>,
    } else {
    }
    %c0 = arith.constant 0 : index
    %c0_1 = arith.constant 0 : index
    %3 = vector.load %arg3[%c0, %c0_1] : memref<128x32xf32, #tpu.memory_space<vmem>>, vector<128x32xf32>
    %c0_2 = arith.constant 0 : index
    %c0_3 = arith.constant 0 : index
    %4 = vector.load %arg4[%c0_2, %c0_3] : memref<32x128xf32, #tpu.memory_space<vmem>>, vector<32x128xf32>
    %cst = arith.constant dense<0.000000e+00> : vector<128x128xf32>
    %5 = tpu.matmul %3, %4, %cst {dimension_numbers = #tpu.dot_dimension_numbers<[1], [0], [0], [1], [0, 0, 1, 1], [], []>} : vector<128x32xf32>, vector<32x128xf32>, vector<128x128xf32> -> vector<128x128xf32>
    %c0_4 = arith.constant 0 : index
    %c0_5 = arith.constant 0 : index
    %6 = vector.load %arg5[%c0_4, %c0_5] : memref<8x128xf32, #tpu.memory_space<vmem>>, vector<8x128xf32>
    %c0_6 = arith.constant 0 : index
    %c0_7 = arith.constant 0 : index
    %7 = vector.load %arg2[%c0_6, %c0_7] : memref<8x128xf32, #tpu.memory_space<vmem>>, vector<8x128xf32>
    %cst_8 = arith.constant dense<0.000000e+00> : vector<8x128xf32>
    %8 = tpu.matmul %7, %5, %cst_8 {dimension_numbers = #tpu.dot_dimension_numbers<[1], [0], [0], [1], [0, 0, 1, 1], [], []>} : vector<8x128xf32>, vector<128x128xf32>, vector<8x128xf32> -> vector<8x128xf32>
    %9 = arith.addf %6, %8 : vector<8x128xf32>
    %c0_9 = arith.constant 0 : index
    %c0_10 = arith.constant 0 : index
    %10 = vector.load %arg5[%c0_9, %c0_10] : memref<8x128xf32, #tpu.memory_space<vmem>>, vector<8x128xf32>
    tpu.vector_store %arg5[%c0_9, %c0_10], %9 {strides = array<i32>} : memref<8x128xf32, #tpu.memory_space<vmem>>, vector<8x128xf32>,
    %c0_i32_11 = arith.constant 0 : i32
    %11 = arith.cmpi eq, %arg1, %c0_i32_11 : i32
    %12 = arith.extui %11 : i1 to i32
    %c0_i32_12 = arith.constant 0 : i32
    %13 = arith.cmpi ne, %12, %c0_i32_12 : i32
    scf.if %13 {
      %c0_13 = arith.constant 0 : index
      %c0_14 = arith.constant 0 : index
      %14 = vector.load %arg5[%c0_13, %c0_14] : memref<8x128xf32, #tpu.memory_space<vmem>>, vector<8x128xf32>
      %15 = math.tanh %14 : vector<8x128xf32>
      %c0_15 = arith.constant 0 : index
      %c0_16 = arith.constant 0 : index
      %16 = vector.load %arg5[%c0_15, %c0_16] : memref<8x128xf32, #tpu.memory_space<vmem>>, vector<8x128xf32>
      tpu.vector_store %arg5[%c0_15, %c0_16], %15 {strides = array<i32>} : memref<8x128xf32, #tpu.memory_space<vmem>>, vector<8x128xf32>,
    } else {
    }
    return
  }
  func.func @transform_0(%arg0: i32, %arg1: i32) -> (i32, i32) {
    %c0_i32 = arith.constant 0 : i32
    return %arg0, %arg1 : i32, i32
  }
  func.func @transform_1(%arg0: i32, %arg1: i32) -> (i32, i32) {
    %c0_i32 = arith.constant 0 : i32
    %c0_i32_0 = arith.constant 0 : i32
    return %arg1, %c0_i32 : i32, i32
  }
  func.func @transform_2(%arg0: i32, %arg1: i32) -> (i32, i32) {
    %c0_i32 = arith.constant 0 : i32
    %c0_i32_0 = arith.constant 0 : i32
    %c0_i32_1 = arith.constant 0 : i32
    return %c0_i32, %c0_i32_0 : i32, i32
  }
  func.func @transform_3(%arg0: i32, %arg1: i32) -> (i32, i32) {
    %c0_i32 = arith.constant 0 : i32
    %c0_i32_0 = arith.constant 0 : i32
    return %arg0, %c0_i32 : i32, i32
  }
}

</mosaic_0001>

<bundles_post_ra>
// kernel: tpu_custom_call.1
= control target key start
LH: loop header
LB: loop body
LE: loop exit
PB: predicated region body
PF: predicated region fallthrough
CT: control target
= control target key end

     0   :  { %8 = vsyncpa [#allocation3], 0  ;;  %s1125_s0 = inlined_call_operand.vmem [shape: f32[16,128], index: 0, kind: input, shape index: {}]   ;;  %s1126_s1 = inlined_call_operand.vmem [shape: f32[128,32], index: 1, kind: input, shape index: {}]   ;;  %s1127_s2 = inlined_call_operand.vmem [shape: f32[32,128], index: 2, kind: input, shape index: {}]   ;;  %s1128_s3 = inlined_call_operand.hbm [shape: f32[16,128], index: 3, kind: output, shape index: {}]  }
   0x1   :  { %10 = vsyncpa [#allocation3 + $0x1], 0  ;;  %s937_s12 = smov 0   ;;  %s939_s13 = smov 0  }
   0x2   :  { %s941_s14 = smov 0   ;;  %s943_s15 = smov 0  }
   0x3   :  { %s945_s16 = smov 0   ;;  %s947_s17 = smov 0  }
   0x4 LB: > { %s609_s18 = sadd.s32 4294967295, %s911_s17   ;;  %s610_s19 = sadd.s32 4294967294, %s911_s17   ;;  %s911_s17 = sphi %s947_s17, %s16_s17   ;;  %s907_s16 = sphi %s945_s16, %s1135_s16   ;;  %s903_s15 = sphi %s943_s15, %s1134_s15   ;;  %s899_s14 = sphi %s941_s14, %s1133_s14   ;;  %s895_s13 = sphi %s939_s13, %s1132_s13   ;;  %s891_s12 = sphi %s937_s12, %s1131_s12  }
   0x5   : > { %s28_s20 = sadd.s32 1, %s907_s16  ;;  %s110_s21 = sadd.s32 1, %s899_s14 }
   0x6   : > { %p30_p0 = scmp.ge.s32.totalorder %s28_s20, 2  ;;  %p120_p1 = scmp.ne.s32.totalorder %s899_s14, %s895_s13 }
   0x7   : > { %p121_p2 = scmp.eq.s32.totalorder %s609_s18, 1  ;;  %p126_p3 = scmp.ne.s32.totalorder %s895_s13, %s891_s12 }
   0x8   : > { %s1137_s20 = smov (%p30_p0, %s28_s20), 0  ;;  %p127_p5 = scmp.eq.s32.totalorder %s610_s19, 1 }
   0x9   : > { %p977_p4 = por %p121_p2, %p120_p1  ;;  %s107_s23 = ssub.s32 %s907_s16, %s1137_s20 }
   0xa   : > { %p614_p6 = scmp.ge.s32.totalorder %s911_s17, 1  ;;  %p108_p7 = scmp.eq.s32.totalorder %s107_s23, 0 }
   0xb   : > { %p984_p8 = por %p127_p5, %p126_p3  ;;  %p167_p9 = scmp.lt.s32.totalorder %s911_s17, 3 }
   0xc   : > { %s990_s25 = scalar_select %p108_p7, %s899_s14, %s110_s21  }
   0xd   : > { %p168_p10 = pnand %p614_p6, %p167_p9 }
   0xe   : > { %v232_v0 = vld [vmem:[%s1127_s2] sm:$0xff] (!%p168_p10)  ;;  %v233_v1 = vld [vmem:[%s1127_s2 + $0x8] sm:$0xff] (!%p168_p10)  ;;  %v234_v2 = vld [vmem:[%s1127_s2 + $0x10] sm:$0xff] (!%p168_p10)  ;;  %vm236_vm0 = vcmask (!%p168_p10), 261120   ;;  %v913_v22 = vmov (!%p168_p10), 0.0|0.0   ;;  %vm914_vm1 = vmmov (!%p168_p10), 0  }
   0xf   : > { %171 = sbr.rel (%p168_p10) target bundleno = 508 (0x1fc), region = 32  ;;  %v741_v3 = vpack.c.bf16 (!%p168_p10), %v233_v1, %v232_v0  ;;  %v235_v4 = vld [vmem:[%s1127_s2 + $0x18] sm:$0xff] (!%p168_p10)  ;;  %v216_v5 = vld [vmem:[%s1126_s1] sm:$0xff] (!%p168_p10)  ;;  %v217_v7 = vld [vmem:[%s1126_s1 + $0x8] sm:$0xff] (!%p168_p10)  ;;  %749 = vmatprep.subr.bf16.mxu1 (!%p168_p10), %v913_v22  ;;  %v915_v23 = vmov (!%p168_p10), 0.0   ;;  %p198_p11 = scmp.lt.s32.totalorder (!%p168_p10), %s903_s15, 1 }
  0x10   : > { %v745_v6 = vpack.c.bf16 (!%p168_p10), %v235_v4, %v234_v2  ;;  %682 = vmatprep.mubr.msk.f32.mxu0 (!%p168_p10), %vm236_vm0, %v216_v5  ;;  %v218_v8 = vld [vmem:[%s1126_s1 + $0x10] sm:$0xff] (!%p168_p10)  ;;  %v219_v9 = vld [vmem:[%s1126_s1 + $0x18] sm:$0xff] (!%p168_p10)  ;;  %v220_v10 = vld [vmem:[%s1126_s1 + $0x20] sm:$0xff] (!%p168_p10)  ;;  %738 = vmatprep.mubr.msk.f32.mxu1 (!%p168_p10), %vm914_vm1, %v915_v23  ;;  %s195_s10 = sand.u32 (!%p168_p10), 1, %s895_s13   ;;  %s634_s18 = sshll.u32 (!%p168_p10), %s903_s15, 7 }
  0x11   : > { %742 = vmatprep.subr.bf16.mxu0 (!%p168_p10), %v741_v3  ;;  %v221_v11 = vld [vmem:[%s1126_s1 + $0x28] sm:$0xff] (!%p168_p10)  ;;  %v222_v12 = vld [vmem:[%s1126_s1 + $0x30] sm:$0xff] (!%p168_p10)  ;;  %v223_v13 = vld [vmem:[%s1126_s1 + $0x38] sm:$0xff] (!%p168_p10)  ;;  %s615_s11 = sshll.u32 (!%p168_p10), %s195_s10, 3  ;;  %s1078_s27 = scalar_lea.hbm (!%p168_p10), %s1128_s3, %s634_s18 }
  0x12   : > { %744 = vmatpush3.bf16.msra.mxu0 (!%p168_p10), %v741_v3  ;;  %v224_v14 = vld [vmem:[%s1126_s1 + $0x40] sm:$0xff] (!%p168_p10)  ;;  %v225_v15 = vld [vmem:[%s1126_s1 + $0x48] sm:$0xff] (!%p168_p10)  ;;  %v226_v16 = vld [vmem:[%s1126_s1 + $0x50] sm:$0xff] (!%p168_p10)  ;;  %s197_s19 = scalar_lea.vmem (!%p168_p10), [#allocation2], %s615_s11  ;;  %s511_s28 = scalar_lea.sflag (!%p168_p10), [#allocation3], %s195_s10 }
  0x13   : > { %746 = vmatprep.subr.bf16.mxu0 (!%p168_p10), %v745_v6  ;;  %v227_v17 = vld [vmem:[%s1126_s1 + $0x58] sm:$0xff] (!%p168_p10)  ;;  %v228_v18 = vld [vmem:[%s1126_s1 + $0x60] sm:$0xff] (!%p168_p10)  ;;  %v229_v19 = vld [vmem:[%s1126_s1 + $0x68] sm:$0xff] (!%p168_p10)  ;;  %s524_s21 = sshll.u32 (!%p168_p10), %s197_s19, 4  ;;  %s1080_s21 = int_to_ptr.vmem [resolvable:$true] %s524_s21 }
  0x14   : > { %v230_v20 = vld [vmem:[%s1126_s1 + $0x70] sm:$0xff] (!%p168_p10)  ;;  %v231_v21 = vld [vmem:[%s1126_s1 + $0x78] sm:$0xff] (!%p168_p10)  ;;  %s833_s29 = scalar_lea.vmem (!%p168_p10), %s1080_s21, 128 }
  0x15   : > { %p834_p12 = scmp.ne.s32.totalorder (!%p168_p10), %s1080_s21, %s833_s29 }
  0x16   : > { %748 = vmatpush3.bf16.msra.mxu0 %v745_v6  ;;  %s199_s5 = scalar_select %p198_p11, %s903_s15, 1 }
  0x17   : > { %p835_p13 = pnand %p834_p12, %p977_p4  ;;  %s916_s15 = smov [#allocation2]  }
  0x18   : > { %s616_s6 = sshll.u32 %s199_s5, 3  ;;  %s837_s30 = sshll.u32 %s916_s15, 4  ;;  %s838_s30 = int_to_ptr.vmem [resolvable:$false] %s837_s30 }
  0x19   : > { %683 = vmatmul.mubr.msk.f32.vlgmr.msra.gmra.mrb[0].mxu0 %vm236_vm0, %v217_v7  ;;  %s204_s9 = scalar_lea.vmem %s1125_s0, %s616_s6  ;;  %p836_p0 = pneg %p835_p13 }
  0x1a   : > { %685 = vmatprep.mubr.msk.f32.mxu0 %vm236_vm0, %v218_v8  ;;  %v431_v48 = vld [vmem:[%s204_s9] sm:$0xff]  ;;  %s839_s4 = scalar_lea.vmem %s838_s30, 256  ;;  %p840_p1 = scmp.lt.s32.totalorder %s1080_s21, %s838_s30 }
  0x1b   : > { %p841_p2 = scmp.lt.s32.totalorder %s839_s4, %s833_s29 }
  0x1d   : > { %686 = vmatmul.mubr.msk.f32.gmra.mrb[2].mxu0 %vm236_vm0, %v219_v9  ;;  %p842_p3 = por %p841_p2, %p840_p1 }
  0x1e   : > { %688 = vmatprep.mubr.msk.f32.mxu0 %vm236_vm0, %v220_v10 }
  0x1f   : > { %p843_p5 = pnand %p842_p3, %p836_p0 }
  0x21   : > { %689 = vmatmul.mubr.msk.f32.gmra.mrb[4].mxu0 %vm236_vm0, %v221_v11 }
  0x22   : > { %691 = vmatprep.mubr.msk.f32.mxu0 %vm236_vm0, %v222_v12 }
  0x25   : > { %692 = vmatmul.mubr.msk.f32.gmra.mrb[6].mxu0 %vm236_vm0, %v223_v13 }
  0x26   : > { %694 = vmatprep.mubr.msk.f32.mxu0 %vm236_vm0, %v224_v14 }
  0x29   : > { %695 = vmatmul.mubr.msk.f32.gmra.mrb[8].mxu0 %vm236_vm0, %v225_v15 }
  0x2a   : > { %697 = vmatprep.mubr.msk.f32.mxu0 %vm236_vm0, %v226_v16 }
  0x2d   : > { %698 = vmatmul.mubr.msk.f32.gmra.mrb[10].mxu0 %vm236_vm0, %v227_v17 }
  0x2e   : > { %700 = vmatprep.mubr.msk.f32.mxu0 %vm236_vm0, %v228_v18 }
  0x31   : > { %701 = vmatmul.mubr.msk.f32.gmra.mrb[12].mxu0 %vm236_vm0, %v229_v19 }
  0x32   : > { %703 = vmatprep.mubr.msk.f32.mxu0 %vm236_vm0, %v230_v20 }
  0x35   : > { %704 = vmatmul.mubr.msk.f32.gmra.mrb[14].mxu0 %vm236_vm0, %v231_v21 }
  0xec   : > { %v684_v24 = vpop.f32.mrb[0].mxu0 }
  0xed   : > { %v351_v25 = vpop.f32.mrb[1].mxu0 }
  0xee   : > { %v750_v26 = vpack.c.bf16 %v684_v24, %v351_v25 }
  0xf0   : > { %v687_v27 = vpop.f32.mrb[2].mxu0  ;;  %751 = vmatpush3.bf16.msra.mxu1 %v750_v26 }
  0xf1   : > { %v361_v28 = vpop.f32.mrb[3].mxu0  ;;  %752 = vmatprep.subr.bf16.mxu1 %v913_v22 }
  0xf2   : > { %v753_v29 = vpack.c.bf16 %v687_v27, %v361_v28 }
  0xf4   : > { %v690_v30 = vpop.f32.mrb[4].mxu0  ;;  %754 = vmatpush3.bf16.msra.mxu1 %v753_v29 }
  0xf5   : > { %v371_v31 = vpop.f32.mrb[5].mxu0  ;;  %755 = vmatprep.subr.bf16.mxu1 %v913_v22 }
  0xf6   : > { %v756_v32 = vpack.c.bf16 %v690_v30, %v371_v31 }
  0xf8   : > { %v693_v33 = vpop.f32.mrb[6].mxu0  ;;  %757 = vmatpush3.bf16.msra.mxu1 %v756_v32 }
  0xf9   : > { %v381_v34 = vpop.f32.mrb[7].mxu0  ;;  %758 = vmatprep.subr.bf16.mxu1 %v913_v22 }
  0xfa   : > { %v759_v35 = vpack.c.bf16 %v693_v33, %v381_v34 }
  0xfc   : > { %v696_v36 = vpop.f32.mrb[8].mxu0  ;;  %760 = vmatpush3.bf16.msra.mxu1 %v759_v35 }
  0xfd   : > { %v391_v37 = vpop.f32.mrb[9].mxu0  ;;  %761 = vmatprep.subr.bf16.mxu1 %v913_v22 }
  0xfe   : > { %v762_v38 = vpack.c.bf16 %v696_v36, %v391_v37 }
 0x100   : > { %v699_v39 = vpop.f32.mrb[10].mxu0  ;;  %763 = vmatpush3.bf16.msra.mxu1 %v762_v38 }
 0x101   : > { %v401_v40 = vpop.f32.mrb[11].mxu0  ;;  %764 = vmatprep.subr.bf16.mxu1 %v913_v22 }
 0x102   : > { %v765_v41 = vpack.c.bf16 %v699_v39, %v401_v40 }
 0x104   : > { %v702_v42 = vpop.f32.mrb[12].mxu0  ;;  %766 = vmatpush3.bf16.msra.mxu1 %v765_v41 }
 0x105   : > { %v411_v43 = vpop.f32.mrb[13].mxu0  ;;  %767 = vmatprep.subr.bf16.mxu1 %v913_v22 }
 0x106   : > { %v768_v44 = vpack.c.bf16 %v702_v42, %v411_v43 }
 0x108   : > { %v705_v45 = vpop.f32.mrb[14].mxu0  ;;  %769 = vmatpush3.bf16.msra.mxu1 %v768_v44 }
 0x109   : > { %v421_v46 = vpop.f32.mrb[15].mxu0  ;;  %770 = vmatprep.subr.bf16.mxu1 %v913_v22 }
 0x10a   : > { %v771_v47 = vpack.c.bf16 %v705_v45, %v421_v46 }
 0x10c   : > { %772 = vmatpush3.bf16.msra.mxu1 %v771_v47 }
 0x10f   : > { %739 = vmatmul.mubr.f32.vlgmr.msra.gmra.mrb[0].mxu1 %v431_v48 }
 0x1e2   : > { %v498_v49 = vpop.f32.mrb[0].mxu1 }
 0x1e3   : > { %v740_v50 = vpop.f32.mrb[1].mxu1  ;;  %831 = vtanh.f32 %v498_v49 }
 0x1ed   : > { %v832_v51 = vpop.eup %831 }
 0x1ee   : > { %509 = vst [vmem:[%s197_s19] sm:$0xff] %v832_v51 }
 0x1ef   : > { %846 = shalt.err (!%p843_p5)
}
 0x1f0   : > { %s847_s5 = scalar_lea.hbm %s1078_s27, 128  ;;  %s851_s8 = scalar_lea.hbm %s1128_s3, 256 }
 0x1f1   : > { %p848_p6 = scmp.ne.s32.totalorder %s1078_s27, %s847_s5  ;;  %p852_p10 = scmp.lt.u32.totalorder %s1078_s27, %s1128_s3 }
 0x1f2   : > { %p853_p11 = scmp.lt.u32.totalorder %s851_s8, %s847_s5  ;;  %p855_p13 = scmp.lt.u32.totalorder %s847_s5, %s1078_s27 }
 0x1f3   : > { %p849_p7 = pnand %p848_p6, %p977_p4 }
 0x1f4   : > { %p854_p12 = por %p853_p11, %p852_p10 }
 0x1f5   : > { %p850_p9 = pneg %p849_p7 }
 0x1f6   : > { %p856_p0 = por %p855_p13, %p854_p12 }
 0x1f8   : > { %p857_p1 = pnand %p856_p0, %p850_p9 }
 0x1fa   : > { %860 = shalt.err (!%p857_p1)
}
 0x1fb   : > { %773 = dma.vmem_to_hbm [thread:$0]  (%p977_p4), %s1080_s21, 128, %s1078_s27, %s511_s28  }
 0x1fc PF: > { %p779_p2 = scmp.ge.s32.totalorder %s911_s17, 2  ;;  %s536_s11 = sand.u32 1, %s891_s12  }
 0x1fd   : > { %s537_s18 = scalar_lea.sflag [#allocation3], %s536_s11 }
 0x1fe   : > { %p776_p3 = pnand %p779_p2, %p984_p8 }
 0x200   : > { %886 = dma.done.wait (!%p776_p3), %s537_s18, 128  }
 0x201   : > { %888 = vsyncadd (!%p776_p3), %s537_s18, 4294967168  ;;  %s16_s17 = sadd.s32 1, %s911_s17   ;;  %s1131_s12 = smov %s895_s13 }
 0x202   : > { %p13_p5 = scmp.ge.s32.totalorder %s16_s17, 4   ;;  %s1132_s13 = smov %s899_s14 }
 0x203   : > { %s1133_s14 = smov %s990_s25  ;;  %s1134_s15 = smov %s907_s16 }
 0x204   : > { %s1135_s16 = smov %s1137_s20  ;;  %15 = sbr.rel (!%p13_p5) target bundleno = 4 (0x4), region = 78 }
 0x20b   :  { %542 = vsyncpa [#allocation3], 1 }
 0x20c   :  { %544 = vsyncpa [#allocation3 + $0x1], 1 }

</bundles_post_ra>
